<compile_context>
chip_gen: v7x
topology: tpu7x:2x2x1
jax: 0.10.0
libtpu: 0.0.40
codegen_flags: <defaults>
</compile_context>

<pallas_src>
import functools

import jax
import jax.numpy as jnp
from jax.experimental import pallas as pl
from jax.experimental.pallas import tpu as pltpu

# MXU operand dtype (bf16 halves HBM/VMEM traffic; accumulation stays f32).
CDTYPE = jnp.bfloat16


def _round_up(x, m):
    return (x + m - 1) // m * m


def _largest_divisor_leq(n, cap):
    cap = max(1, min(n, cap))
    for d in range(cap, 0, -1):
        if n % d == 0:
            return d
    return 1


# ---------------------------------------------------------------------------
# Tiled matmul + bias (+ ReLU)   --   classifier Linears
# ---------------------------------------------------------------------------

def _matmul_bias_kernel(x_ref, w_ref, b_ref, o_ref, acc_ref, *, relu):
    @pl.when(pl.program_id(2) == 0)
    def _():
        acc_ref[...] = jnp.zeros_like(acc_ref)

    acc_ref[...] += jnp.dot(x_ref[...], w_ref[...],
                            preferred_element_type=jnp.float32)

    @pl.when(pl.program_id(2) == pl.num_programs(2) - 1)
    def _():
        r = acc_ref[...] + b_ref[...]            # f32 epilogue
        if relu:
            r = jnp.maximum(r, 0.0)
        o_ref[...] = r.astype(o_ref.dtype)


def matmul_bias(x, w, b, *, relu, out_dtype=None, tm=256, tn=512, tk=1024):
    """(M, K) @ (K, N) + b with optional fused ReLU, K-reduction tiling."""
    m, k = x.shape
    k2, n = w.shape
    assert k == k2
    out_dtype = out_dtype or x.dtype
    # Dims below the tile target stay un-tiled (full block => no alignment
    # constraint); larger dims are tiled and zero-padded to a tile multiple.
    tm = m if m <= tm else tm
    tn = n if n <= tn else tn
    tk = k if k <= tk else tk
    mp, kp, np_ = _round_up(m, tm), _round_up(k, tk), _round_up(n, tn)
    if (mp, kp) != (m, k):
        x = jnp.pad(x, ((0, mp - m), (0, kp - k)))
    if (kp, np_) != (k, n):
        w = jnp.pad(w, ((0, kp - k), (0, np_ - n)))
    b2 = jnp.pad(b.astype(jnp.float32), ((0, np_ - n),)).reshape(1, np_)

    out = pl.pallas_call(
        functools.partial(_matmul_bias_kernel, relu=relu),
        out_shape=jax.ShapeDtypeStruct((mp, np_), out_dtype),
        grid=(mp // tm, np_ // tn, kp // tk),
        in_specs=[
            pl.BlockSpec((tm, tk), lambda i, j, kk: (i, kk)),
            pl.BlockSpec((tk, tn), lambda i, j, kk: (kk, j)),
            pl.BlockSpec((1, tn), lambda i, j, kk: (0, j)),
        ],
        out_specs=pl.BlockSpec((tm, tn), lambda i, j, kk: (i, j)),
        scratch_shapes=[pltpu.VMEM((tm, tn), jnp.float32)],
        compiler_params=pltpu.CompilerParams(
            dimension_semantics=("parallel", "parallel", "arbitrary")),
    )(x, w, b2)
    if (mp, np_) != (m, n):
        out = out[:m, :n]
    return out


# ---------------------------------------------------------------------------
# Conv3x3 (stride 1, pad 1) + ReLU, one output row per grid step
# ---------------------------------------------------------------------------

def _conv3x3_kernel(x0_ref, x1_ref, x2_ref, w_ref, b_ref, o_ref):
    n, _, wo, cout = o_ref.shape
    cin = x0_ref.shape[-1]
    rows = (x0_ref[...], x1_ref[...], x2_ref[...])   # each (N, 1, W+2, Cin)
    acc = jnp.zeros((n * wo, cout), jnp.float32)
    for dy in range(3):
        row = rows[dy][:, 0, :, :]                   # (N, W+2, Cin)
        for dx in range(3):
            patch = row[:, dx:dx + wo, :].reshape(n * wo, cin)
            acc = acc + jnp.dot(patch, w_ref[dy * 3 + dx],
                                preferred_element_type=jnp.float32)
    acc = jnp.maximum(acc + b_ref[...], 0.0)         # f32 bias + ReLU
    o_ref[...] = acc.reshape(n, 1, wo, cout).astype(o_ref.dtype)


def conv3x3_relu(x, w, b):
    """nn.Conv2d(k=3, stride=1, pad=1) + ReLU on NHWC input.
    x: (N, H, W, Cin); w: (Cout, Cin, 3, 3) torch layout; b: (Cout,)."""
    n, h, wd, cin = x.shape
    cout = w.shape[0]
    cin_p = _round_up(cin, 8)                        # pad contraction dim
    xp = jnp.pad(x, ((0, 0), (1, 1), (1, 1), (0, cin_p - cin)))
    wt = jnp.transpose(w, (2, 3, 1, 0))              # (3, 3, Cin, Cout)
    wt = jnp.pad(wt, ((0, 0), (0, 0), (0, cin_p - cin), (0, 0)))
    wt = wt.reshape(9, cin_p, cout).astype(x.dtype)
    b2 = b.astype(jnp.float32).reshape(1, cout)

    return pl.pallas_call(
        _conv3x3_kernel,
        out_shape=jax.ShapeDtypeStruct((n, h, wd, cout), x.dtype),
        grid=(h,),
        in_specs=[
            pl.BlockSpec((n, 1, wd + 2, cin_p), lambda i: (0, i, 0, 0)),
            pl.BlockSpec((n, 1, wd + 2, cin_p), lambda i: (0, i + 1, 0, 0)),
            pl.BlockSpec((n, 1, wd + 2, cin_p), lambda i: (0, i + 2, 0, 0)),
            pl.BlockSpec((9, cin_p, cout), lambda i: (0, 0, 0)),
            pl.BlockSpec((1, cout), lambda i: (0, 0)),
        ],
        out_specs=pl.BlockSpec((n, 1, wd, cout), lambda i: (0, i, 0, 0)),
        compiler_params=pltpu.CompilerParams(
            dimension_semantics=("parallel",)),
    )(xp, xp, xp, wt, b2)


# ---------------------------------------------------------------------------
# Fused 2x2 max pool (stride 2) over H and W in one kernel
# ---------------------------------------------------------------------------

def _maxpool2x2_kernel(x_ref, o_ref):
    x = x_ref[...]                                          # (N, 2*th, W, C)
    hm = jnp.maximum(x[:, 0::2, :, :], x[:, 1::2, :, :])    # pool over H
    n, th, w, c = hm.shape
    r = hm.reshape(n, th, w // 2, 2 * c)                    # pair adjacent cols
    o_ref[...] = jnp.maximum(r[..., :c], r[..., c:])        # pool over W


def maxpool2x2(x):
    """nn.MaxPool2d(kernel_size=2, stride=2) on NHWC."""
    n, h, w, c = x.shape
    assert h % 2 == 0 and w % 2 == 0
    hout, wout = h // 2, w // 2
    row_bytes = n * 2 * w * c * x.dtype.itemsize     # input bytes per out-row
    th = _largest_divisor_leq(hout, max(1, (2 << 20) // max(1, row_bytes)))
    return pl.pallas_call(
        _maxpool2x2_kernel,
        out_shape=jax.ShapeDtypeStruct((n, hout, wout, c), x.dtype),
        grid=(hout // th,),
        in_specs=[pl.BlockSpec((n, 2 * th, w, c), lambda i: (0, i, 0, 0))],
        out_specs=pl.BlockSpec((n, th, wout, c), lambda i: (0, i, 0, 0)),
        compiler_params=pltpu.CompilerParams(
            dimension_semantics=("parallel",)),
    )(x)


# ---------------------------------------------------------------------------
# VGG forward
# ---------------------------------------------------------------------------

def vgg_forward(x_nchw, params):
    # TODO(synk): training-mode Dropout(p=0.5) not implemented; eval-mode
    # dropout is the identity, matching inference semantics.
    x = jnp.transpose(x_nchw, (0, 2, 3, 1)).astype(CDTYPE)   # NCHW -> NHWC once
    for layer in params["features"]:
        if layer[0] == "conv":
            _, w, b = layer
            x = conv3x3_relu(x, w.astype(CDTYPE), b)
        else:                                        # 'pool' -> MaxPool2d(2,2)
            x = maxpool2x2(x)
    n, hf, wf, cf = x.shape
    flat = x.reshape(n, hf * wf * cf)                # NHWC flatten, no transpose
    (w1, b1), (w2, b2), (w3, b3) = params["classifier"]
    # torch.flatten acts on NCHW; instead of transposing the activation we
    # permute w1's input columns (one-time, weight-side) into NHWC order.
    w1p = w1.reshape(-1, cf, hf, wf).transpose(0, 2, 3, 1).reshape(w1.shape[0], -1)
    x = matmul_bias(flat, w1p.T.astype(CDTYPE), b1, relu=True, out_dtype=CDTYPE)
    x = matmul_bias(x, w2.T.astype(CDTYPE), b2, relu=True, out_dtype=CDTYPE)
    x = matmul_bias(x, w3.T.astype(CDTYPE), b3, relu=False, out_dtype=jnp.float32)
    return x


# ---------------------------------------------------------------------------
# Deterministic parameter construction (xavier-uniform weights; small non-zero
# biases so the bias path is exercised numerically).
# ---------------------------------------------------------------------------

def _xavier(key, shape, fan_in, fan_out):
    bound = (6.0 / (fan_in + fan_out)) ** 0.5
    return jax.random.uniform(key, shape, jnp.float32, -bound, bound)


def make_params(key, in_channels, cfg, hidden, num_classes, final_spatial):
    features = []
    c = in_channels
    for v in cfg:
        if v == "M":
            features.append(("pool",))
        else:
            key, kw, kb = jax.random.split(key, 3)
            w = _xavier(kw, (v, c, 3, 3), fan_in=c * 9, fan_out=v * 9)
            b = jax.random.uniform(kb, (v,), jnp.float32, -0.1, 0.1)
            features.append(("conv", w, b))
            c = v
    feat_dim = c * final_spatial * final_spatial
    classifier = []
    for din, dout in [(feat_dim, hidden), (hidden, hidden),
                      (hidden, num_classes)]:
        key, kw, kb = jax.random.split(key, 3)
        w = _xavier(kw, (dout, din), fan_in=din, fan_out=dout)  # torch (out,in)
        b = jax.random.uniform(kb, (dout,), jnp.float32, -0.1, 0.1)
        classifier.append((w, b))
    return {"features": features, "classifier": classifier}


# Pure-JAX reference (mirrors the bf16-operand / f32-accumulation numerics and
# the torch NCHW flatten order) for the correctness check.
def vgg_reference(x_nchw, params):
    x = jnp.transpose(x_nchw, (0, 2, 3, 1)).astype(CDTYPE)
    for layer in params["features"]:
        if layer[0] == "conv":
            _, w, b = layer
            w_hwio = jnp.transpose(w, (2, 3, 1, 0)).astype(CDTYPE)
            y = jax.lax.conv_general_dilated(
                x, w_hwio, (1, 1), "SAME",
                dimension_numbers=("NHWC", "HWIO", "NHWC"),
                preferred_element_type=jnp.float32)
            x = jnp.maximum(y + b, 0.0).astype(CDTYPE)
        else:
            x = jax.lax.reduce_window(
                x, jnp.array(-jnp.inf, x.dtype), jax.lax.max,
                (1, 2, 2, 1), (1, 2, 2, 1), "VALID")
    n = x.shape[0]
    x = jnp.transpose(x, (0, 3, 1, 2)).reshape(n, -1)   # torch flatten order

    def lin(v, w, b, relu):
        y = jnp.dot(v.astype(CDTYPE), w.T.astype(CDTYPE),
                    preferred_element_type=jnp.float32) + b
        return jnp.maximum(y, 0.0) if relu else y

    (w1, b1), (w2, b2), (w3, b3) = params["classifier"]
    x = lin(x, w1, b1, True).astype(CDTYPE)
    x = lin(x, w2, b2, True).astype(CDTYPE)
    return lin(x, w3, b3, False)


if __name__ == "__main__":
    key = jax.random.PRNGKey(0)
    N, C_IN, H, W = 2, 4, 16, 16
    cfg = [8, "M", 16, "M"]                  # scaled-down VGG feature config
    hidden, num_classes = 32, 10             # stands in for 4096 / 1000
    final_spatial = H // 4                   # two 2x2 pools: 16 -> 4

    key, kx = jax.random.split(key)
    x = jax.random.normal(kx, (N, C_IN, H, W), jnp.float32)
    params = make_params(key, C_IN, cfg, hidden, num_classes, final_spatial)

    # Standalone check of the tiled GEMM path (multi-block M/N/K + padding).
    ka, kb = jax.random.split(jax.random.PRNGKey(1))
    a = jax.random.normal(ka, (80, 200), jnp.float32)
    wm = jax.random.normal(kb, (200, 150), jnp.float32)
    bm = jnp.linspace(-1.0, 1.0, 150, dtype=jnp.float32)
    got = jax.block_until_ready(
        matmul_bias(a, wm, bm, relu=True, tm=32, tn=128, tk=128))
    want = jnp.maximum(a @ wm + bm, 0.0)
    assert jnp.allclose(got, want, atol=1e-3, rtol=1e-3), \
        float(jnp.max(jnp.abs(got - want)))

    # Full VGG forward (Pallas) vs pure-JAX reference.
    out = jax.block_until_ready(vgg_forward(x, params))
    ref = vgg_reference(x, params)
    assert out.shape == (N, num_classes), out.shape
    assert jnp.allclose(out, ref, atol=5e-2, rtol=5e-2), \
        float(jnp.max(jnp.abs(out - ref)))
    print("KERNEL_OK")
</pallas_src>

<mosaic_0001>
module attributes {stable_mosaic.version = 11 : i64} {
  func.func @_matmul_bias_kernel(%arg0: i32, %arg1: i32, %arg2: i32, %arg3: memref<32x128xf32, #tpu.memory_space<vmem>>, %arg4: memref<128x128xf32, #tpu.memory_space<vmem>>, %arg5: memref<1x128xf32, #tpu.memory_space<vmem>>, %arg6: memref<32x128xf32, #tpu.memory_space<vmem>>, %arg7: memref<32x128xf32, #tpu.memory_space<vmem>>) attributes {dimension_semantics = [#tpu.dimension_semantics<parallel>, #tpu.dimension_semantics<parallel>, #tpu.dimension_semantics<arbitrary>], iteration_bounds = array<i64: 3, 2, 2>, scalar_prefetch = 0 : i64, scratch_operands = 1 : i64, tpu.core_type = #tpu.core_type<tc>, window_params = [{transform_indices = @transform_0, window_bounds = array<i64: 32, 128>}, {transform_indices = @transform_1, window_bounds = array<i64: 128, 128>}, {transform_indices = @transform_2, window_bounds = array<i64: 1, 128>}, {transform_indices = @transform_3, window_bounds = array<i64: 32, 128>}]} {
    %c0_i32 = arith.constant 0 : i32
    %0 = arith.cmpi eq, %arg2, %c0_i32 : i32
    %1 = arith.extui %0 : i1 to i32
    %c0_i32_0 = arith.constant 0 : i32
    %2 = arith.cmpi ne, %1, %c0_i32_0 : i32
    scf.if %2 {
      %cst_9 = arith.constant 0.000000e+00 : f32
      %12 = vector.broadcast %cst_9 : f32 to vector<32x128xf32>
      %c0_10 = arith.constant 0 : index
      %c0_11 = arith.constant 0 : index
      %13 = vector.load %arg7[%c0_10, %c0_11] : memref<32x128xf32, #tpu.memory_space<vmem>>, vector<32x128xf32>
      tpu.vector_store %arg7[%c0_10, %c0_11], %12 {strides = array<i32>} : memref<32x128xf32, #tpu.memory_space<vmem>>, vector<32x128xf32>,
    } else {
    }
    %c0 = arith.constant 0 : index
    %c0_1 = arith.constant 0 : index
    %3 = vector.load %arg7[%c0, %c0_1] : memref<32x128xf32, #tpu.memory_space<vmem>>, vector<32x128xf32>
    %c0_2 = arith.constant 0 : index
    %c0_3 = arith.constant 0 : index
    %4 = vector.load %arg3[%c0_2, %c0_3] : memref<32x128xf32, #tpu.memory_space<vmem>>, vector<32x128xf32>
    %c0_4 = arith.constant 0 : index
    %c0_5 = arith.constant 0 : index
    %5 = vector.load %arg4[%c0_4, %c0_5] : memref<128x128xf32, #tpu.memory_space<vmem>>, vector<128x128xf32>
    %cst = arith.constant dense<0.000000e+00> : vector<32x128xf32>
    %6 = tpu.matmul %4, %5, %cst {dimension_numbers = #tpu.dot_dimension_numbers<[1], [0], [0], [1], [0, 0, 1, 1], [], []>} : vector<32x128xf32>, vector<128x128xf32>, vector<32x128xf32> -> vector<32x128xf32>
    %7 = arith.addf %3, %6 : vector<32x128xf32>
    %c0_6 = arith.constant 0 : index
    %c0_7 = arith.constant 0 : index
    %8 = vector.load %arg7[%c0_6, %c0_7] : memref<32x128xf32, #tpu.memory_space<vmem>>, vector<32x128xf32>
    tpu.vector_store %arg7[%c0_6, %c0_7], %7 {strides = array<i32>} : memref<32x128xf32, #tpu.memory_space<vmem>>, vector<32x128xf32>,
    %c1_i32 = arith.constant 1 : i32
    %9 = arith.cmpi eq, %arg2, %c1_i32 : i32
    %10 = arith.extui %9 : i1 to i32
    %c0_i32_8 = arith.constant 0 : i32
    %11 = arith.cmpi ne, %10, %c0_i32_8 : i32
    scf.if %11 {
      %c0_9 = arith.constant 0 : index
      %c0_10 = arith.constant 0 : index
      %12 = vector.load %arg7[%c0_9, %c0_10] : memref<32x128xf32, #tpu.memory_space<vmem>>, vector<32x128xf32>
      %c0_11 = arith.constant 0 : index
      %c0_12 = arith.constant 0 : index
      %13 = vector.load %arg5[%c0_11, %c0_12] : memref<1x128xf32, #tpu.memory_space<vmem>>, vector<1x128xf32>
      %14 = vector.broadcast %13 : vector<1x128xf32> to vector<32x128xf32>
      %15 = arith.addf %12, %14 : vector<32x128xf32>
      %cst_13 = arith.constant 0.000000e+00 : f32
      %16 = vector.broadcast %cst_13 : f32 to vector<32x128xf32>
      %17 = arith.maximumf %15, %16 : vector<32x128xf32>
      %c0_14 = arith.constant 0 : index
      %c0_15 = arith.constant 0 : index
      %18 = vector.load %arg6[%c0_14, %c0_15] : memref<32x128xf32, #tpu.memory_space<vmem>>, vector<32x128xf32>
      tpu.vector_store %arg6[%c0_14, %c0_15], %17 {strides = array<i32>} : memref<32x128xf32, #tpu.memory_space<vmem>>, vector<32x128xf32>,
    } else {
    }
    return
  }
  func.func @transform_0(%arg0: i32, %arg1: i32, %arg2: i32) -> (i32, i32) {
    %c0_i32 = arith.constant 0 : i32
    return %arg0, %arg2 : i32, i32
  }
  func.func @transform_1(%arg0: i32, %arg1: i32, %arg2: i32) -> (i32, i32) {
    %c0_i32 = arith.constant 0 : i32
    return %arg2, %arg1 : i32, i32
  }
  func.func @transform_2(%arg0: i32, %arg1: i32, %arg2: i32) -> (i32, i32) {
    %c0_i32 = arith.constant 0 : i32
    %c0_i32_0 = arith.constant 0 : i32
    return %c0_i32, %arg1 : i32, i32
  }
  func.func @transform_3(%arg0: i32, %arg1: i32, %arg2: i32) -> (i32, i32) {
    %c0_i32 = arith.constant 0 : i32
    return %arg0, %arg1 : i32, i32
  }
}

</mosaic_0001>

<bundles_post_ra>
// kernel: tpu_custom_call.1
= control target key start
LH: loop header
LB: loop body
LE: loop exit
PB: predicated region body
PF: predicated region fallthrough
CT: control target
= control target key end

     0   :  { %s1550_s0 = inlined_call_operand.hbm [shape: f32[96,256], index: 0, kind: input, shape index: {}]   ;;  %s1551_s1 = inlined_call_operand.hbm [shape: f32[256,256], index: 1, kind: input, shape index: {}]   ;;  %s1552_s2 = inlined_call_operand.vmem [shape: f32[1,256], index: 2, kind: input, shape index: {}]   ;;  %s1553_s3 = inlined_call_operand.hbm [shape: f32[96,256], index: 3, kind: output, shape index: {}]  }
   0x1   :  { %1571 = sst [smem:[#allocation19_spill]] %s1550_s0 }
   0x2   :  { %1572 = sst [smem:[#allocation20_spill]] %s1551_s1 }
   0x3   :  { %1573 = sst [smem:[#allocation21_spill]] %s1553_s3 }
   0x4   :  { %8 = vsyncpa [#allocation4], 0 }
   0x5   :  { %10 = vsyncpa [#allocation4 + $0x1], 0 }
   0x6   :  { %11 = vsyncpa [#allocation7], 0 }
   0x7   :  { %13 = vsyncpa [#allocation7 + $0x1], 0 }
   0x8   :  { %14 = vsyncpa [#allocation5], 0 }
   0x9   :  { %16 = vsyncpa [#allocation5 + $0x1], 0  ;;  %s1117_s12 = smov 0   ;;  %s1119_s13 = smov 0  }
   0xa   :  { %s1121_s14 = smov 0   ;;  %s1123_s15 = smov 0  }
   0xb   :  { %s1125_s16 = smov 0   ;;  %s1127_s17 = smov 0  }
   0xc   :  { %s1129_s18 = smov 0   ;;  %s1131_s19 = smov 0  }
   0xd   :  { %s1133_s20 = smov 0   ;;  %s1135_s21 = smov 0  }
   0xe   :  { %s1137_s22 = smov 0   ;;  %s1139_s23 = smov 0  }
   0xf   :  { %s1141_s24 = smov 0   ;;  %s1143_s25 = smov 0  }
  0x10   :  { %s1145_s26 = smov 0   ;;  %s1147_s27 = smov 0  }
  0x11 LB: > { %1574 = sst [smem:[#allocation12_spill]] %s1061_s21  ;;  %s34_s28 = sadd.s32 1, %s1073_s24  ;;  %s1085_s27 = sphi %s1147_s27, %s22_s27   ;;  %s1081_s26 = sphi %s1145_s26, %s1615_s26   ;;  %s1077_s25 = sphi %s1143_s25, %s1628_s25   ;;  %s1073_s24 = sphi %s1141_s24, %s1627_s24   ;;  %s1069_s23 = sphi %s1139_s23, %s1612_s23   ;;  %s1065_s22 = sphi %s1137_s22, %s1626_s22   ;;  %s1061_s21 = sphi %s1135_s21, %s1625_s21   ;;  %s1057_s20 = sphi %s1133_s20, %s1624_s20   ;;  %s1053_s19 = sphi %s1131_s19, %s1623_s19   ;;  %s1049_s18 = sphi %s1129_s18, %s1622_s18   ;;  %s1045_s17 = sphi %s1127_s17, %s1621_s17   ;;  %s1041_s16 = sphi %s1125_s16, %s1620_s16   ;;  %s1037_s15 = sphi %s1123_s15, %s1619_s15   ;;  %s1033_s14 = sphi %s1121_s14, %s1618_s14   ;;  %s1029_s13 = sphi %s1119_s13, %s1617_s13   ;;  %s1025_s12 = sphi %s1117_s12, %s1616_s12  }
  0x12   : > { %1575 = sst [smem:[#allocation13_spill]] %s1069_s23  ;;  %s1554_s29 = sadd.s32 4294967295, %s1085_s27  }
  0x13   : > { %1576 = sst [smem:[#allocation14_spill]] %s1081_s26  ;;  %p1197_p0 = scmp.ge.s32.totalorder %s34_s28, 2 }
  0x14   : > { %p57_p1 = scmp.ne.s32.totalorder %s1057_s20, %s1053_s19  ;;  %p1558_p2 = scmp.eq.s32.totalorder %s1085_s27, 0 }
  0x15   : > { %s1630_s28 = smov (%p1197_p0, %s34_s28), 0  ;;  %p63_p3 = scmp.ne.s32.totalorder %s1053_s19, %s1049_s18 }
  0x16   : > { %1578 = sst [smem:[#allocation15_spill]] %s1630_s28  ;;  %p1213_p4 = scmp.eq.s32.totalorder %s1554_s29, 0 }
  0x17   : > { %s1219_s7 = ssub.s32 %s1073_s24, %s1630_s28  ;;  %p59_p5 = por %p1558_p2, %p57_p1 }
  0x18   : > { %s1579_s6 = scalar_select %p1213_p4, 1, 0 }
  0x19   : > { %p1225_p6 = por %p1213_p4, %p63_p3  ;;  %p1557_p7 = scmp.lt.s32.totalorder %s1085_s27, 12 }
  0x1a   : > { %s169_s9 = sand.u32 1, %s1057_s20   ;;  %s596_s11 = sshll.u32 %s1081_s26, 3 }
  0x1b   : > { %s1580_s8 = scalar_select %p1225_p6, 1, 0 }
  0x1c   : > { %s575_s10 = sshll.u32 %s169_s9, 5  ;;  %s179_s18 = sadd.s32 %s1073_s24, %s596_s11 }
  0x1d   : > { %s173_s5 = scalar_lea.vmem [#allocation3], %s575_s10  ;;  %s578_s29 = sshll.u32 %s179_s18, 7 }
  0x1e   : > { %s182_s4 = sshll.u32 %s173_s5, 4  ;;  %s1581_s0 = sld [smem:[#allocation19_spill]]  ;;  %s1233_s4 = int_to_ptr.vmem [resolvable:$true] %s182_s4 }
  0x1f   : > { %p1242_p8 = pnand %p1557_p7, %p59_p5  ;;  %s1246_s5 = scalar_lea.sflag [#allocation4], %s169_s9 }
  0x21   : > { %p861_p10 = pneg %p1242_p8 }
  0x24   : > { %s1238_s23 = scalar_lea.hbm %s1581_s0, %s578_s29  ;;  %s864_s29 = scalar_lea.hbm %s1581_s0, 3072 }
  0x25   : > { %s859_s10 = scalar_lea.hbm %s1238_s23, 512  ;;  %p865_p13 = scmp.lt.u32.totalorder %s1238_s23, %s1581_s0 }
  0x26   : > { %p860_p9 = scmp.ne.s32.totalorder %s1238_s23, %s859_s10  ;;  %p866_p1 = scmp.lt.u32.totalorder %s864_s29, %s859_s10 }
  0x27   : > { %p868_p5 = scmp.lt.u32.totalorder %s859_s10, %s1238_s23 }
  0x28   : > { %p862_p11 = pnand %p861_p10, %p860_p9  ;;  %p867_p3 = por %p866_p1, %p865_p13 }
  0x2a   : > { %p863_p12 = pneg %p862_p11  ;;  %p869_p7 = por %p868_p5, %p867_p3 }
  0x2c   : > { %p870_p2 = pnand %p869_p7, %p863_p12 }
  0x2e   : > { %873 = shalt.err (!%p870_p2)
}
  0x2f   : > { %s874_s9 = scalar_lea.vmem %s1233_s4, 512  ;;  %s1087_s3 = smov [#allocation3]  }
  0x30   : > { %p875_p9 = scmp.ne.s32.totalorder %s1233_s4, %s874_s9  ;;  %s879_s28 = sshll.u32 %s1087_s3, 4  ;;  %s880_s28 = int_to_ptr.vmem [resolvable:$false] %s879_s28 }
  0x31   : > { %s881_s11 = scalar_lea.vmem %s880_s28, 1024  ;;  %p882_p4 = scmp.lt.s32.totalorder %s1233_s4, %s880_s28 }
  0x32   : > { %p877_p11 = pnand %p875_p9, %p861_p10  ;;  %p883_p13 = scmp.lt.s32.totalorder %s881_s11, %s874_s9 }
  0x34   : > { %p878_p6 = pneg %p877_p11  ;;  %p884_p1 = por %p883_p13, %p882_p4 }
  0x36   : > { %p885_p3 = pnand %p884_p1, %p878_p6 }
  0x38   : > { %888 = shalt.err (!%p885_p3)
}
  0x39   : > { %s1561_s10 = smov 256   ;;  %s1562_s29 = smov 128  }
  0x3a   : > { %s1563_s18 = smov 8   ;;  %p583_p2 = scmp.ge.s32.totalorder %s1085_s27, 1 }
  0x3b   : > { %714 = dma.hbm_to_vmem [thread:$0]  (!%p1242_p8), %s1238_s23, 512, %s1233_s4, %s1246_s5, %s1561_s10, %s1562_s29, %s1563_s18  }
  0x3c   : > { %p219_p4 = scmp.lt.s32.totalorder %s1085_s27, 13  ;;  %s1583_s9 = sadd.s32 4294967295, %s1085_s27  }
  0x3d   : > { %p1281_p6 = scmp.eq.s32.totalorder %s1583_s9, 11  ;;  %s572_s21 = sadd.s32 4294967294, %s1085_s27  }
  0x3e   : > { %p1285_p7 = pnand %p583_p2, %p219_p4  ;;  %s37_s11 = sadd.s32 1, %s1077_s25 }
  0x3f   : > { %s1632_s11 = smov (!%p1197_p0, %s37_s11), %s1077_s25  ;;  %s78_s23 = sadd.s32 1, %s1045_s17 }
  0x40   : > { %p91_p8 = scmp.ne.s32.totalorder %s1041_s16, %s1037_s15  ;;  %p39_p10 = scmp.ge.s32.totalorder %s1632_s11, 2 }
  0x41   : > { %p85_p12 = scmp.ne.s32.totalorder %s1045_s17, %s1041_s16  ;;  %p1586_p5 = scmp.ne.s32.totalorder %s1579_s6, 0 }
  0x42   : > { %s132_s5 = sadd.s32 1, %s1033_s14  ;;  %s1634_s11 = smov (%p39_p10, %s1632_s11), 0 }
  0x43   : > { %p1301_p9 = por %p91_p8, %p1586_p5  ;;  %1588 = sst [smem:[#allocation16_spill]] %s1634_s11 }
  0x44   : > { %s1589_s9 = sadd.s32 1, %s1081_s26  ;;  %s74_s30 = ssub.s32 %s1077_s25, %s1634_s11 }
  0x45   : > { %s1587_s4 = scalar_select %p1301_p9, 1, 0 }
  0x46   : > { %s1636_s9 = smov (!%p39_p10, %s1589_s9), %s1081_s26  ;;  %p142_p0 = scmp.ne.s32.totalorder %s1033_s14, %s1029_s13 }
  0x47   : > { %p43_p11 = scmp.ge.s32.totalorder %s1636_s9, 3  ;;  %s75_s15 = sor.u32 %s74_s30, %s1219_s7 }
  0x48   : > { %p76_p13 = scmp.eq.s32.totalorder %s75_s15, 0  ;;  %p1318_p1 = por %p1281_p6, %p142_p0 }
  0x49   : > { %s1638_s9 = smov (%p43_p11, %s1636_s9), 0  ;;  %p148_p3 = scmp.ne.s32.totalorder %s1029_s13, %s1025_s12 }
  0x4a   : > { %s1590_s6 = scalar_select %p1318_p1, 1, 0 }
  0x4b   : > { %1592 = sst [smem:[#allocation18_spill]] %s1638_s9  ;;  %s45_s29 = ssub.s32 %s1081_s26, %s1638_s9 }
  0x4c   : > { %1591 = sst [smem:[#allocation17_spill]] %s1590_s6  ;;  %s47_s18 = sor.u32 %s1219_s7, %s45_s29 }
  0x4d   : > { %s1325_s10 = scalar_select %p76_p13, %s1045_s17, %s78_s23  }
  0x4e   : > { %s129_s0 = sor.u32 %s74_s30, %s45_s29  ;;  %p48_p2 = scmp.eq.s32.totalorder %s47_s18, 0 }
  0x4f   : > { %p130_p4 = scmp.eq.s32.totalorder %s129_s0, 0  ;;  %p149_p8 = scmp.eq.s32.totalorder %s572_s21, 11 }
  0x50   : > { %s192_s3 = sand.u32 1, %s1045_s17   ;;  %s1593_s15 = sadd.s32 1, %s1057_s20 }
  0x51   : > { %s1336_s11 = scalar_select %p48_p2, %s1057_s20, %s1593_s15  }
  0x52   : > { %s1339_s6 = scalar_select %p130_p4, %s1033_s14, %s132_s5  }
  0x53   : > { %p1594_p6 = scmp.eq.s32.totalorder %s1085_s27, 0  ;;  %p1346_p5 = por %p149_p8, %p148_p3 }
  0x54   : > { %s579_s9 = sshll.u32 %s192_s3, 7  ;;  %s597_s7 = sshll.u32 %s1073_s24, 5 }
  0x55   : > { %p87_p10 = por %p85_p12, %p1594_p6  ;;  %s202_s29 = sadd.s32 %s1077_s25, %s597_s7 }
  0x56   : > { %s1595_s23 = scalar_select %p1346_p5, 1, 0 }
  0x57   : > { %s582_s18 = sshll.u32 %s202_s29, 7  ;;  %s196_s30 = scalar_lea.vmem [#allocation6], %s579_s9 }
  0x58   : > { %s205_s0 = sshll.u32 %s196_s30, 4  ;;  %s1596_s1 = sld [smem:[#allocation20_spill]]  ;;  %s1357_s0 = int_to_ptr.vmem [resolvable:$true] %s205_s0 }
  0x59   : > { %p1597_p12 = scmp.lt.s32.totalorder %s1085_s27, 12  ;;  %s1365_s9 = scalar_lea.sflag [#allocation7], %s192_s3 }
  0x5b   : > { %p1361_p0 = pnand %p1597_p12, %p87_p10 }
  0x5d   : > { %p891_p13 = pneg %p1361_p0 }
  0x5e   : > { %s1355_s15 = scalar_lea.hbm %s1596_s1, %s582_s18  ;;  %s894_s18 = scalar_lea.hbm %s1596_s1, 8192 }
  0x5f   : > { %s889_s7 = scalar_lea.hbm %s1355_s15, 2048  ;;  %p895_p4 = scmp.lt.u32.totalorder %s1355_s15, %s1596_s1 }
  0x60   : > { %p890_p11 = scmp.ne.s32.totalorder %s1355_s15, %s889_s7  ;;  %p896_p8 = scmp.lt.u32.totalorder %s894_s18, %s889_s7 }
  0x61   : > { %p898_p10 = scmp.lt.u32.totalorder %s889_s7, %s1355_s15 }
  0x62   : > { %p892_p3 = pnand %p891_p13, %p890_p11  ;;  %p897_p6 = por %p896_p8, %p895_p4 }
  0x64   : > { %p893_p2 = pneg %p892_p3  ;;  %p899_p12 = por %p898_p10, %p897_p6 }
  0x66   : > { %p900_p5 = pnand %p899_p12, %p893_p2 }
  0x68   : > { %903 = shalt.err (!%p900_p5)
}
  0x69   : > { %s904_s3 = scalar_lea.vmem %s1357_s0, 2048  ;;  %s1091_s26 = smov [#allocation6]  }
  0x6a   : > { %p905_p11 = scmp.ne.s32.totalorder %s1357_s0, %s904_s3  ;;  %s909_s29 = sshll.u32 %s1091_s26, 4  ;;  %s910_s29 = int_to_ptr.vmem [resolvable:$false] %s909_s29 }
  0x6b   : > { %s911_s30 = scalar_lea.vmem %s910_s29, 4096  ;;  %p912_p9 = scmp.lt.s32.totalorder %s1357_s0, %s910_s29 }
  0x6c   : > { %p907_p3 = pnand %p905_p11, %p891_p13  ;;  %p913_p4 = scmp.lt.s32.totalorder %s911_s30, %s904_s3 }
  0x6e   : > { %p908_p1 = pneg %p907_p3  ;;  %p914_p8 = por %p913_p4, %p912_p9 }
  0x70   : > { %p915_p6 = pnand %p914_p8, %p908_p1 }
  0x72   : > { %918 = shalt.err (!%p915_p6)
}
  0x73   : > { %s1599_s7 = smov 8   ;;  %s1600_s18 = smov 128  }
  0x74   : > { %s1601_s21 = smov 256   ;;  %223 = sbr.rel (%p1285_p7) target bundleno = 439 (0x1b7), region = 32 }
  0x75   : > { %717 = dma.hbm_to_vmem [thread:$0]  (!%p1361_p0), %s1355_s15, 2048, %s1357_s0, %s1365_s9, %s1601_s21, %s1600_s18, %s1599_s7  }
  0x76   : > { %s225_s26 = sand.u32 (!%p1285_p7), 1, %s1053_s19   ;;  %p1602_p9 = scmp.ne.s32.totalorder (!%p1285_p7), %s1580_s8, 0 }
  0x77   : > { %s584_s29 = sshll.u32 (!%p1285_p7), %s225_s26, 5  ;;  %s226_s3 = scalar_lea.sflag (!%p1285_p7), [#allocation4], %s225_s26 }
  0x78   : > { %s1399_s30 = scalar_lea.vmem (!%p1285_p7), [#allocation3], %s584_s29 }
  0x7b   : > { %1012 = dma.done.wait (%p1602_p9), %s226_s3, 512  }
  0x7c   : > { %1014 = vsyncadd (%p1602_p9), %s226_s3, 4294966784  ;;  %s234_s5 = sand.u32 1, %s1041_s16   ;;  %p1603_p7 = scmp.ne.s32.totalorder %s1587_s4, 0 }
  0x7d   : > { %s585_s1 = sshll.u32 %s234_s5, 7  ;;  %s235_s0 = scalar_lea.sflag [#allocation7], %s234_s5 }
  0x7e   : > { %s1406_s15 = scalar_lea.vmem [#allocation6], %s585_s1 }
  0x7f   : > { %1016 = dma.done.wait (%p1603_p7), %s235_s0, 2048  }
  0x80   : > { %1018 = vsyncadd (%p1603_p7), %s235_s0, 4294965248  ;;  %s266_s28 = sand.u32 1, %s1029_s13   ;;  %p271_p1 = scmp.lt.s32.totalorder %s1065_s22, 1 }
  0x81   : > { %s586_s8 = sshll.u32 %s266_s28, 5  ;;  %s1604_s26 = sld [smem:[#allocation12_spill]] }
  0x82   : > { %s1417_s9 = scalar_select %p271_p1, %s1065_s22, 1 }
  0x83   : > { %s1423_s21 = scalar_lea.vmem [#allocation8], %s586_s8 }
  0x84   : > { %s273_s1 = scalar_lea.vmem %s1552_s2, %s1417_s9 }
  0x87   : > { %p587_p5 = scmp.ne.s32.totalorder %s1604_s26, 0 }
  0x88   : > { %v1092_v0 = vmov (!%p587_p5), 0.0  }
  0x89   : > { %278 = sbr.rel (%p587_p5) target bundleno = 144 (0x90), region = 44  ;;  %279 = vst [vmem:[#allocation2] sm:$0xff] (!%p587_p5), %v1092_v0  ;;  %280 = vst [vmem:[#allocation2 + $0x8] sm:$0xff] (!%p587_p5), %v1092_v0 }
  0x8a   : > { %281 = vst [vmem:[#allocation2 + $0x10] sm:$0xff] (!%p587_p5), %v1092_v0  ;;  %282 = vst [vmem:[#allocation2 + $0x18] sm:$0xff] (!%p587_p5), %v1092_v0 }
  0x90 PF: > { %v291_v1 = vld [vmem:[%s1406_s15] sm:$0xff]  ;;  %v292_v2 = vld [vmem:[%s1406_s15 + $0x8] sm:$0xff]  ;;  %v293_v3 = vld [vmem:[%s1406_s15 + $0x10] sm:$0xff]  ;;  %s1605_s4 = sld [smem:[#allocation12_spill]] }
  0x91   : > { %v657_v4 = vpack.c.bf16 %v292_v2, %v291_v1  ;;  %v294_v5 = vld [vmem:[%s1406_s15 + $0x18] sm:$0xff]  ;;  %v295_v7 = vld [vmem:[%s1406_s15 + $0x20] sm:$0xff]  ;;  %v296_v8 = vld [vmem:[%s1406_s15 + $0x28] sm:$0xff] }
  0x92   : > { %v661_v6 = vpack.c.bf16 %v294_v5, %v293_v3  ;;  %v665_v9 = vpack.c.bf16 %v296_v8, %v295_v7  ;;  %v287_v10 = vld [vmem:[%s1399_s30] sm:$0xff]  ;;  %v289_v11 = vld [vmem:[%s1399_s30 + $0x10] sm:$0xff]  ;;  %v298_v13 = vld [vmem:[%s1406_s15 + $0x38] sm:$0xff] }
  0x93   : > { %658 = vmatprep.subr.bf16.mxu0 %v657_v4  ;;  %689 = vmatprep.subr.bf16.mxu1 %v657_v4  ;;  %v297_v12 = vld [vmem:[%s1406_s15 + $0x30] sm:$0xff]  ;;  %v299_v15 = vld [vmem:[%s1406_s15 + $0x40] sm:$0xff]  ;;  %v300_v16 = vld [vmem:[%s1406_s15 + $0x48] sm:$0xff] }
  0x94   : > { %660 = vmatpush3.bf16.msra.mxu0 %v657_v4  ;;  %697 = vmatpush3.bf16.msra.mxu1 %v657_v4  ;;  %v669_v14 = vpack.c.bf16 %v298_v13, %v297_v12  ;;  %v673_v17 = vpack.c.bf16 %v300_v16, %v299_v15  ;;  %v301_v18 = vld [vmem:[%s1406_s15 + $0x50] sm:$0xff]  ;;  %v302_v19 = vld [vmem:[%s1406_s15 + $0x58] sm:$0xff]  ;;  %v303_v21 = vld [vmem:[%s1406_s15 + $0x60] sm:$0xff] }
  0x95   : > { %662 = vmatprep.subr.bf16.mxu0 %v661_v6  ;;  %690 = vmatprep.subr.bf16.mxu1 %v661_v6  ;;  %v677_v20 = vpack.c.bf16 %v302_v19, %v301_v18  ;;  %v304_v22 = vld [vmem:[%s1406_s15 + $0x68] sm:$0xff]  ;;  %v305_v24 = vld [vmem:[%s1406_s15 + $0x70] sm:$0xff]  ;;  %v306_v25 = vld [vmem:[%s1406_s15 + $0x78] sm:$0xff] }
  0x96   : > { %651 = vmatprep.mubr.f32.mxu0 %v287_v10  ;;  %654 = vmatprep.mubr.f32.mxu1 %v289_v11  ;;  %v681_v23 = vpack.c.bf16 %v304_v22, %v303_v21  ;;  %v685_v26 = vpack.c.bf16 %v306_v25, %v305_v24  ;;  %v288_v27 = vld [vmem:[%s1399_s30 + $0x8] sm:$0xff]  ;;  %v290_v28 = vld [vmem:[%s1399_s30 + $0x18] sm:$0xff]  ;;  %v283_v31 = vld [vmem:[#allocation2] sm:$0xff]  ;;  %p588_p0 = scmp.ne.s32.totalorder %s1605_s4, 1 }
  0x97   : > { %v284_v29 = vld [vmem:[#allocation2 + $0x8] sm:$0xff]  ;;  %v286_v30 = vld [vmem:[#allocation2 + $0x18] sm:$0xff]  ;;  %v285_v32 = vld [vmem:[#allocation2 + $0x10] sm:$0xff] }
  0x98   : > { %664 = vmatpush3.bf16.msra.mxu0 %v661_v6  ;;  %698 = vmatpush3.bf16.msra.mxu1 %v661_v6  ;;  %v589_v42 = vld [vmem:[%s273_s1] ss:$0 sm:$0xff] (!%p588_p0) }
  0x99   : > { %666 = vmatprep.subr.bf16.mxu0 %v665_v9  ;;  %691 = vmatprep.subr.bf16.mxu1 %v665_v9 }
  0x9c   : > { %668 = vmatpush3.bf16.msra.mxu0 %v665_v9  ;;  %699 = vmatpush3.bf16.msra.mxu1 %v665_v9 }
  0x9d   : > { %670 = vmatprep.subr.bf16.mxu0 %v669_v14  ;;  %692 = vmatprep.subr.bf16.mxu1 %v669_v14 }
  0xa0   : > { %672 = vmatpush3.bf16.msra.mxu0 %v669_v14  ;;  %700 = vmatpush3.bf16.msra.mxu1 %v669_v14 }
  0xa1   : > { %674 = vmatprep.subr.bf16.mxu0 %v673_v17  ;;  %693 = vmatprep.subr.bf16.mxu1 %v673_v17 }
  0xa4   : > { %676 = vmatpush3.bf16.msra.mxu0 %v673_v17  ;;  %701 = vmatpush3.bf16.msra.mxu1 %v673_v17 }
  0xa5   : > { %678 = vmatprep.subr.bf16.mxu0 %v677_v20  ;;  %694 = vmatprep.subr.bf16.mxu1 %v677_v20 }
  0xa8   : > { %680 = vmatpush3.bf16.msra.mxu0 %v677_v20  ;;  %702 = vmatpush3.bf16.msra.mxu1 %v677_v20 }
  0xa9   : > { %682 = vmatprep.subr.bf16.mxu0 %v681_v23  ;;  %695 = vmatprep.subr.bf16.mxu1 %v681_v23 }
  0xac   : > { %684 = vmatpush3.bf16.msra.mxu0 %v681_v23  ;;  %703 = vmatpush3.bf16.msra.mxu1 %v681_v23 }
  0xad   : > { %686 = vmatprep.subr.bf16.mxu0 %v685_v26  ;;  %696 = vmatprep.subr.bf16.mxu1 %v685_v26 }
  0xb0   : > { %688 = vmatpush3.bf16.msra.mxu0 %v685_v26  ;;  %704 = vmatpush3.bf16.msra.mxu1 %v685_v26 }
  0xb3   : > { %652 = vmatmul.mubr.f32.vlgmr.msra.gmra.mrb[0].mxu0 %v288_v27  ;;  %655 = vmatmul.mubr.f32.vlgmr.msra.gmra.mrb[0].mxu1 %v290_v28 }
 0x184   : > { %403 = sbr.rel (%p588_p0) target bundleno = 407 (0x197), region = 48 }
 0x186   : > { %v653_v33 = vpop.f32.mrb[0].mxu0  ;;  %v656_v34 = vpop.f32.mrb[0].mxu1 }
 0x187   : > { %v393_v35 = vadd.f32 %v653_v33, %v284_v29  ;;  %v395_v36 = vadd.f32 %v656_v34, %v286_v30  ;;  %v373_v37 = vpop.f32.mrb[1].mxu0  ;;  %v383_v38 = vpop.f32.mrb[1].mxu1 }
 0x188   : > { %v392_v39 = vadd.f32 %v373_v37, %v283_v31  ;;  %v394_v40 = vadd.f32 %v383_v38, %v285_v32 }
 0x189   : > { %397 = vst [vmem:[#allocation2 + $0x8] sm:$0xff] %v393_v35  ;;  %399 = vst [vmem:[#allocation2 + $0x18] sm:$0xff] %v395_v36 }
 0x18a   : > { %396 = vst [vmem:[#allocation2] sm:$0xff] %v392_v39  ;;  %398 = vst [vmem:[#allocation2 + $0x10] sm:$0xff] %v394_v40 }
 0x190   : > { %v405_v43 = vld [vmem:[#allocation2 + $0x8] sm:$0xff]  ;;  %v407_v47 = vld [vmem:[#allocation2 + $0x18] sm:$0xff] }
 0x191   : > { %v404_v41 = vld [vmem:[#allocation2] sm:$0xff]  ;;  %v416_v45 = vadd.f32 %v589_v42, %v405_v43  ;;  %v406_v46 = vld [vmem:[#allocation2 + $0x10] sm:$0xff]  ;;  %v418_v49 = vadd.f32 %v589_v42, %v407_v47 }
 0x192   : > { %v415_v44 = vadd.f32 %v589_v42, %v404_v41  ;;  %v417_v48 = vadd.f32 %v589_v42, %v406_v46 }
 0x193   : > { %v420_v51 = vmax.f32 %v416_v45, 0.0  ;;  %v422_v53 = vmax.f32 %v418_v49, 0.0 }
 0x194   : > { %v419_v50 = vmax.f32 %v415_v44, 0.0  ;;  %v421_v52 = vmax.f32 %v417_v48, 0.0 }
 0x195   : > { %424 = vst [vmem:[%s1423_s21 + $0x8] sm:$0xff] %v420_v51  ;;  %426 = vst [vmem:[%s1423_s21 + $0x18] sm:$0xff] %v422_v53 }
 0x196   : > { %423 = vst [vmem:[%s1423_s21] sm:$0xff] %v419_v50  ;;  %425 = vst [vmem:[%s1423_s21 + $0x10] sm:$0xff] %v421_v52 }
 0x197 PF: > { %s1606_s30 = sld [smem:[#allocation13_spill]]  ;;  %s1607_s5 = sld [smem:[#allocation17_spill]] }
 0x198   : > { %s443_s8 = sshll.u32 %s1423_s21, 4  ;;  %s1608_s1 = sld [smem:[#allocation21_spill]]  ;;  %s1459_s8 = int_to_ptr.vmem [resolvable:$true] %s443_s8 }
 0x199   : > { %s1468_s4 = scalar_lea.sflag [#allocation5], %s266_s28  ;;  %s919_s29 = scalar_lea.vmem %s1459_s8, 512 }
 0x19a   : > { %p920_p13 = scmp.ne.s32.totalorder %s1459_s8, %s919_s29 }
 0x19d   : > { %s598_s0 = sshll.u32 %s1606_s30, 3  ;;  %p1609_p2 = scmp.ne.s32.totalorder %s1607_s5, 0 }
 0x19e   : > { %s440_s15 = sadd.s32 %s1065_s22, %s598_s0  ;;  %s1093_s22 = smov [#allocation8]  }
 0x19f   : > { %s593_s9 = sshll.u32 %s440_s15, 7  ;;  %p921_p10 = pnand %p920_p13, %p1609_p2 }
 0x1a0   : > { %s1464_s26 = scalar_lea.hbm %s1608_s1, %s593_s9  ;;  %s923_s21 = sshll.u32 %s1093_s22, 4  ;;  %s924_s21 = int_to_ptr.vmem [resolvable:$false] %s923_s21 }
 0x1a1   : > { %p922_p12 = pneg %p921_p10  ;;  %s925_s3 = scalar_lea.vmem %s924_s21, 1024 }
 0x1a2   : > { %p926_p11 = scmp.lt.s32.totalorder %s1459_s8, %s924_s21  ;;  %p927_p3 = scmp.lt.s32.totalorder %s925_s3, %s919_s29 }
 0x1a4   : > { %p928_p4 = por %p927_p3, %p926_p11 }
 0x1a6   : > { %p929_p8 = pnand %p928_p4, %p922_p12 }
 0x1a8   : > { %932 = shalt.err (!%p929_p8)
}
 0x1a9   : > { %s933_s28 = scalar_lea.hbm %s1464_s26, 512  ;;  %s937_s15 = scalar_lea.hbm %s1608_s1, 3072 }
 0x1aa   : > { %p934_p6 = scmp.ne.s32.totalorder %s1464_s26, %s933_s28  ;;  %p938_p1 = scmp.lt.u32.totalorder %s1464_s26, %s1608_s1 }
 0x1ab   : > { %p939_p5 = scmp.lt.u32.totalorder %s937_s15, %s933_s28  ;;  %p941_p13 = scmp.lt.u32.totalorder %s933_s28, %s1464_s26 }
 0x1ac   : > { %p935_p9 = pnand %p934_p6, %p1609_p2 }
 0x1ad   : > { %p940_p0 = por %p939_p5, %p938_p1 }
 0x1ae   : > { %p936_p7 = pneg %p935_p9 }
 0x1af   : > { %p942_p10 = por %p941_p13, %p940_p0 }
 0x1b1   : > { %p943_p12 = pnand %p942_p10, %p936_p7 }
 0x1b3   : > { %946 = shalt.err (!%p943_p12)
}
 0x1b4   : > { %s1094_s18 = smov 128   ;;  %s1095_s29 = smov 256  }
 0x1b5   : > { %s1096_s22 = smov 8  }
 0x1b6   : > { %709 = dma.vmem_to_hbm [thread:$0]  (%p1609_p2), %s1459_s8, 512, %s1464_s26, %s1468_s4, %s1094_s18, %s1095_s29, %s1096_s22  }
 0x1b7 PF: > { %p723_p11 = scmp.ge.s32.totalorder %s1085_s27, 2  ;;  %s458_s21 = sand.u32 1, %s1025_s12  }
 0x1b8   : > { %p1610_p3 = scmp.ne.s32.totalorder %s1595_s23, 0  ;;  %s459_s3 = scalar_lea.sflag [#allocation5], %s458_s21 }
 0x1ba   : > { %p719_p4 = pnand %p723_p11, %p1610_p3 }
 0x1bc   : > { %1020 = dma.done.wait (!%p719_p4), %s459_s3, 512  }
 0x1bd   : > { %1022 = vsyncadd (!%p719_p4), %s459_s3, 4294966784  ;;  %s22_s27 = sadd.s32 1, %s1085_s27   ;;  %s1612_s23 = sld [smem:[#allocation14_spill]] }
 0x1be   : > { %p1497_p8 = scmp.ge.s32.totalorder %s22_s27, 14   ;;  %s1613_s5 = sld [smem:[#allocation15_spill]] }
 0x1bf   : > { %s1614_s8 = sld [smem:[#allocation16_spill]]  ;;  %s1615_s26 = sld [smem:[#allocation18_spill]] }
 0x1c0   : > { %s1616_s12 = smov %s1029_s13  ;;  %s1617_s13 = smov %s1033_s14 }
 0x1c1   : > { %s1618_s14 = smov %s1339_s6  ;;  %s1619_s15 = smov %s1041_s16 }
 0x1c2   : > { %s1620_s16 = smov %s1045_s17  ;;  %s1621_s17 = smov %s1325_s10 }
 0x1c3   : > { %s1622_s18 = smov %s1053_s19  ;;  %s1623_s19 = smov %s1057_s20 }
 0x1c4   : > { %s1624_s20 = smov %s1336_s11  ;;  %s1625_s21 = smov %s1073_s24 }
 0x1c5   : > { %s1626_s22 = smov %s1077_s25  ;;  %s1627_s24 = smov %s1613_s5 }
 0x1c6   : > { %s1628_s25 = smov %s1614_s8  ;;  %21 = sbr.rel (!%p1497_p8) target bundleno = 17 (0x11), region = 101 }
 0x1cd   :  { %464 = vsyncpa [#allocation4], 1 }
 0x1ce   :  { %466 = vsyncpa [#allocation4 + $0x1], 1 }
 0x1cf   :  { %467 = vsyncpa [#allocation7], 1 }
 0x1d0   :  { %469 = vsyncpa [#allocation7 + $0x1], 1 }
 0x1d1   :  { %470 = vsyncpa [#allocation5], 1 }
 0x1d2   :  { %472 = vsyncpa [#allocation5 + $0x1], 1 }

</bundles_post_ra>
